<compile_context>
chip_gen: v5e
topology: v5e:2x2
jax: 0.10.0
libtpu: 0.0.40
codegen_flags: <defaults>
</compile_context>

<pallas_src>
import numpy as np
import jax
import jax.numpy as jnp
from jax.experimental import pallas as pl
from jax.experimental.pallas import tpu as pltpu


# ---------------------------------------------------------------------------
# Model constants (synthetic backbone + head sizes)
# ---------------------------------------------------------------------------
ALPHA = 4            # SLOWFAST.ALPHA (temporal subsampling of slow pathway)
C_SLOW = 16          # slow-pathway feature channels (synthetic backbone)
C_FAST = 4           # fast-pathway feature channels (synthetic backbone)
C_TOT = C_SLOW + C_FAST
K_VERB = 8           # num_classes[0]
K_NOUN = 12          # num_classes[1]
K_TOT = K_VERB + K_NOUN
EMB_OFF = K_TOT      # lane offset of the embedding inside the packed output slab
OUT_LANES = 128      # lane-dense packed output row: [verb(8) | noun(12) | emb(20) | 0 pad]


# ---------------------------------------------------------------------------
# Fused Pallas kernel: stems + global pooling + merged verb/noun head
# ---------------------------------------------------------------------------
def _fused_kernel(x_ref, pool_ref, ws_ref, bs_ref, wf_ref, bf_ref,
                  wps_ref, wpf_ref, bp_ref, out_ref):
    """One grid step == one batch sample (grid axis marked "parallel").

      x_ref    : (1, 1, T*F)  flattened log-mel patch (lane-dense)
      pool_ref : (2, T*F)     row 0 = slow pooling weights (linspace index counts),
                              row 1 = fast pooling weights (uniform 1/(T*F))
      ws/bs    : (C_SLOW, 1)  slow stem 1x1-conv scale / bias (column layout)
      wf/bf    : (C_FAST, 1)  fast stem 1x1-conv scale / bias
      wps/wpf  : (C_*, K_TOT) merged [verb | noun] projection weight, split by pathway
      bp       : (1, K_TOT)   merged projection bias
      out_ref  : (1, 1, 128)  packed [verb probs | noun probs | embedding | zero pad]
    """
    xv = x_ref[0]                                                # (1, TF)
    pw = pool_ref[...]                                           # (2, TF)

    # Synthetic per-pathway stems (1x1 conv + ReLU). Feature maps live only in vregs.
    ys = jnp.maximum(xv * ws_ref[...] + bs_ref[...], 0.0)        # (C_SLOW, TF)
    yf = jnp.maximum(xv * wf_ref[...] + bf_ref[...], 0.0)        # (C_FAST, TF)

    # Global avg-pool fused with the slow-pathway time subsampling:
    # mean over linspace-selected time rows == count-weighted mean over all rows.
    zs = jnp.einsum('ad,cd->ac', pw[0:1], ys,
                    preferred_element_type=jnp.float32)          # (1, C_SLOW)
    zf = jnp.einsum('ad,cd->ac', pw[1:2], yf,
                    preferred_element_type=jnp.float32)          # (1, C_FAST)

    # Merged verb+noun projection; per-pathway split avoids a channel concat/relayout.
    logits = (jnp.dot(zs, wps_ref[...], preferred_element_type=jnp.float32)
              + jnp.dot(zf, wpf_ref[...], preferred_element_type=jnp.float32)
              + bp_ref[...])                                     # (1, K_TOT)

    def _softmax(l):
        m = jnp.max(l, axis=-1, keepdims=True)
        e = jnp.exp(l - m)
        # approx=False: keep exact row sums (matches PyTorch softmax semantics)
        return e * pl.reciprocal(jnp.sum(e, axis=-1, keepdims=True), approx=False)

    pv = _softmax(logits[:, :K_VERB])                            # (1, K_VERB)
    pn = _softmax(logits[:, K_VERB:])                            # (1, K_NOUN)

    # Packed lane-dense output slab (HBM writeback is one dense 128-lane row).
    out_ref[...] = jnp.zeros_like(out_ref)
    out_ref[0, :, 0:K_VERB] = pv
    out_ref[0, :, K_VERB:K_TOT] = pn
    out_ref[0, :, EMB_OFF:EMB_OFF + C_SLOW] = zs                 # embedding == z[:, 0, 0]
    out_ref[0, :, EMB_OFF + C_SLOW:EMB_OFF + C_TOT] = zf


# ---------------------------------------------------------------------------
# Host helpers
# ---------------------------------------------------------------------------
def pack_pathway_output(spec, alpha=ALPHA):
    """Reference semantics: [N,1,T,F] -> [slow (T//alpha rows), fast (all rows)]."""
    t = spec.shape[-2]
    assert t >= alpha, "time axis shorter than SLOWFAST.ALPHA"
    idx = np.linspace(0.0, t - 1, t // alpha).astype(np.int64)   # == torch.linspace(...).long()
    return [spec[:, :, idx, :], spec]


def _slow_fast_pool_weights(t, f):
    """Per-element pooling weights so that the fused kernel's weighted sums equal
    (a) the mean over linspace-selected time rows (slow) and (b) the plain mean (fast)."""
    assert t >= ALPHA, "time axis shorter than SLOWFAST.ALPHA"
    t_slow = t // ALPHA
    idx = np.linspace(0.0, t - 1, t_slow).astype(np.int64)
    counts = np.bincount(idx, minlength=t).astype(np.float32)    # exact even with repeats
    w_slow = np.repeat(counts / (t_slow * f), f)                 # (T*F,), index t*F + f
    w_fast = np.full((t * f,), 1.0 / (t * f), np.float32)
    return np.stack([w_slow, w_fast], axis=0).astype(np.float32)  # (2, T*F)


def init_params(key):
    ks = jax.random.split(key, 8)
    return {
        # stem scale/bias stored as (1, C) (perf review item 5)
        "w_slow": 0.1 * jax.random.normal(ks[0], (1, C_SLOW), jnp.float32),
        "b_slow": 0.1 * jax.random.normal(ks[1], (1, C_SLOW), jnp.float32),
        "w_fast": 0.1 * jax.random.normal(ks[2], (1, C_FAST), jnp.float32),
        "b_fast": 0.1 * jax.random.normal(ks[3], (1, C_FAST), jnp.float32),
        # projection weights stored as (C_total, K)  (== nn.Linear weight transposed)
        "w_verb": 0.05 * jax.random.normal(ks[4], (C_TOT, K_VERB), jnp.float32),
        "b_verb": 0.05 * jax.random.normal(ks[5], (1, K_VERB), jnp.float32),
        "w_noun": 0.05 * jax.random.normal(ks[6], (C_TOT, K_NOUN), jnp.float32),
        "b_noun": 0.05 * jax.random.normal(ks[7], (1, K_NOUN), jnp.float32),
    }


# ---------------------------------------------------------------------------
# Forward
# ---------------------------------------------------------------------------
@jax.jit
def _forward(spec, params):
    n, ch, t, f = spec.shape
    assert ch == 1
    tf = t * f
    x = spec.reshape(n, 1, tf)                                   # lane-dense input
    pool_w = jnp.asarray(_slow_fast_pool_weights(t, f))          # (2, TF), static shapes

    ws = params["w_slow"].reshape(C_SLOW, 1)
    bs = params["b_slow"].reshape(C_SLOW, 1)
    wf = params["w_fast"].reshape(C_FAST, 1)
    bf = params["b_fast"].reshape(C_FAST, 1)
    # merge verb+noun projections into one weight/bias, split by pathway
    wp = jnp.concatenate([params["w_verb"], params["w_noun"]], axis=1)   # (C_TOT, K_TOT)
    wps, wpf = wp[:C_SLOW], wp[C_SLOW:]
    bp = jnp.concatenate([params["b_verb"], params["b_noun"]], axis=1)   # (1, K_TOT)

    out = pl.pallas_call(
        _fused_kernel,
        out_shape=jax.ShapeDtypeStruct((n, 1, OUT_LANES), jnp.float32),
        grid_spec=pltpu.PrefetchScalarGridSpec(
            num_scalar_prefetch=0,
            grid=(n,),
            in_specs=[
                pl.BlockSpec((1, 1, tf), lambda i: (i, 0, 0)),           # x (per-sample)
                pl.BlockSpec((2, tf), lambda i: (0, 0)),                 # pooling weights
                pl.BlockSpec((C_SLOW, 1), lambda i: (0, 0)),             # ws
                pl.BlockSpec((C_SLOW, 1), lambda i: (0, 0)),             # bs
                pl.BlockSpec((C_FAST, 1), lambda i: (0, 0)),             # wf
                pl.BlockSpec((C_FAST, 1), lambda i: (0, 0)),             # bf
                pl.BlockSpec((C_SLOW, K_TOT), lambda i: (0, 0)),         # wps
                pl.BlockSpec((C_FAST, K_TOT), lambda i: (0, 0)),         # wpf
                pl.BlockSpec((1, K_TOT), lambda i: (0, 0)),              # bp
            ],
            out_specs=pl.BlockSpec((1, 1, OUT_LANES), lambda i: (i, 0, 0)),
        ),
        compiler_params=pltpu.CompilerParams(
            dimension_semantics=("parallel",)),                  # shards batch over TCs on v7x
    )(x, pool_w, ws, bs, wf, bf, wps, wpf, bp)

    slab = out.reshape(n, OUT_LANES)
    yv = slab[:, :K_VERB]
    yn = slab[:, K_VERB:K_TOT]
    emb = slab[:, EMB_OFF:EMB_OFF + C_TOT]
    return yv, yn, emb


def audio_slowfast_forward(spec, params, return_embedding=False):
    """Eval-mode forward. spec: (N, 1, T, F) float32 log-mel patches."""
    yv, yn, emb = _forward(spec, params)
    y = (yv, yn)                       # num_classes is a (verb, noun) tuple
    if return_embedding:
        return y, emb                  # emb == z[:, 0, 0]
    return y


# ---------------------------------------------------------------------------
# main
# ---------------------------------------------------------------------------
if __name__ == "__main__":
    key = jax.random.PRNGKey(0)
    k_par, k_in = jax.random.split(key)

    params = init_params(k_par)

    # Small spectrogram batch consistent with prepare_audio output: (N, 1, time, freq)
    N, T, F = 2, 32, 16
    spec = jax.random.normal(k_in, (N, 1, T, F), jnp.float32)

    (yv, yn), emb = audio_slowfast_forward(spec, params, return_embedding=True)
    jax.block_until_ready((yv, yn, emb))

    # sanity: shapes + softmax rows sum to 1 (exact division used in kernel)
    assert yv.shape == (N, K_VERB) and yn.shape == (N, K_NOUN)
    assert emb.shape == (N, C_TOT)
    assert bool(jnp.allclose(jnp.sum(yv, axis=-1), 1.0, atol=1e-4))
    assert bool(jnp.allclose(jnp.sum(yn, axis=-1), 1.0, atol=1e-4))

    # pure-JAX reference of the same forward (gather + pool + cat + linear + softmax)
    def ref_forward(spec_in, p):
        slow, fast = pack_pathway_output(np.asarray(spec_in))

        def stem_pool(xin, w, b):
            y = jnp.maximum(jnp.asarray(xin) * w.reshape(1, -1, 1, 1)
                            + b.reshape(1, -1, 1, 1), 0.0)
            return jnp.mean(y, axis=(2, 3))

        zs = stem_pool(slow, p["w_slow"], p["b_slow"])
        zf = stem_pool(fast, p["w_fast"], p["b_fast"])
        z = jnp.concatenate([zs, zf], axis=-1)
        rv = jax.nn.softmax(z @ p["w_verb"] + p["b_verb"], axis=-1)
        rn = jax.nn.softmax(z @ p["w_noun"] + p["b_noun"], axis=-1)
        return rv, rn, z

    rv, rn, rz = ref_forward(spec, params)
    assert bool(jnp.allclose(yv, rv, atol=2e-3, rtol=2e-3))
    assert bool(jnp.allclose(yn, rn, atol=2e-3, rtol=2e-3))
    assert bool(jnp.allclose(emb, rz, atol=2e-3, rtol=2e-3))

    print("KERNEL_OK")
</pallas_src>

<mosaic_0001>
module attributes {stable_mosaic.version = 11 : i64} {
  func.func @_fused_kernel(%arg0: i32, %arg1: memref<1x1x512xf32, #tpu.memory_space<vmem>>, %arg2: memref<2x512xf32, #tpu.memory_space<vmem>>, %arg3: memref<16x1xf32, #tpu.memory_space<vmem>>, %arg4: memref<16x1xf32, #tpu.memory_space<vmem>>, %arg5: memref<4x1xf32, #tpu.memory_space<vmem>>, %arg6: memref<4x1xf32, #tpu.memory_space<vmem>>, %arg7: memref<16x20xf32, #tpu.memory_space<vmem>>, %arg8: memref<4x20xf32, #tpu.memory_space<vmem>>, %arg9: memref<1x20xf32, #tpu.memory_space<vmem>>, %arg10: memref<1x1x128xf32, #tpu.memory_space<vmem>>) attributes {dimension_semantics = [#tpu.dimension_semantics<parallel>], iteration_bounds = array<i64: 2>, scalar_prefetch = 0 : i64, scratch_operands = 0 : i64, tpu.core_type = #tpu.core_type<tc>, window_params = [{transform_indices = @transform_0, window_bounds = array<i64: 1, 1, 512>}, {pipeline_mode = #tpu.pipeline_mode<synchronous>, transform_indices = @transform_1, window_bounds = array<i64: 2, 512>}, {pipeline_mode = #tpu.pipeline_mode<synchronous>, transform_indices = @transform_2, window_bounds = array<i64: 16, 1>}, {pipeline_mode = #tpu.pipeline_mode<synchronous>, transform_indices = @transform_3, window_bounds = array<i64: 16, 1>}, {pipeline_mode = #tpu.pipeline_mode<synchronous>, transform_indices = @transform_4, window_bounds = array<i64: 4, 1>}, {pipeline_mode = #tpu.pipeline_mode<synchronous>, transform_indices = @transform_5, window_bounds = array<i64: 4, 1>}, {pipeline_mode = #tpu.pipeline_mode<synchronous>, transform_indices = @transform_6, window_bounds = array<i64: 16, 20>}, {pipeline_mode = #tpu.pipeline_mode<synchronous>, transform_indices = @transform_7, window_bounds = array<i64: 4, 20>}, {pipeline_mode = #tpu.pipeline_mode<synchronous>, transform_indices = @transform_8, window_bounds = array<i64: 1, 20>}, {transform_indices = @transform_9, window_bounds = array<i64: 1, 1, 128>}]} {
    %c0 = arith.constant 0 : index
    %c0_0 = arith.constant 0 : index
    %c0_1 = arith.constant 0 : index
    %0 = vector.load %arg1[%c0, %c0_0, %c0_1] : memref<1x1x512xf32, #tpu.memory_space<vmem>>, vector<1x1x512xf32>
    %1 = vector.shape_cast %0 : vector<1x1x512xf32> to vector<1x512xf32>
    %c0_2 = arith.constant 0 : index
    %c0_3 = arith.constant 0 : index
    %2 = vector.load %arg2[%c0_2, %c0_3] : memref<2x512xf32, #tpu.memory_space<vmem>>, vector<2x512xf32>
    %c0_4 = arith.constant 0 : index
    %c0_5 = arith.constant 0 : index
    %3 = vector.load %arg3[%c0_4, %c0_5] : memref<16x1xf32, #tpu.memory_space<vmem>>, vector<16x1xf32>
    %4 = vector.broadcast %1 : vector<1x512xf32> to vector<16x512xf32>
    %5 = vector.broadcast %3 : vector<16x1xf32> to vector<16x512xf32>
    %6 = arith.mulf %4, %5 : vector<16x512xf32>
    %c0_6 = arith.constant 0 : index
    %c0_7 = arith.constant 0 : index
    %7 = vector.load %arg4[%c0_6, %c0_7] : memref<16x1xf32, #tpu.memory_space<vmem>>, vector<16x1xf32>
    %8 = vector.broadcast %7 : vector<16x1xf32> to vector<16x512xf32>
    %9 = arith.addf %6, %8 : vector<16x512xf32>
    %cst = arith.constant 0.000000e+00 : f32
    %10 = vector.broadcast %cst : f32 to vector<16x512xf32>
    %11 = arith.maximumf %9, %10 : vector<16x512xf32>
    %c0_8 = arith.constant 0 : index
    %c0_9 = arith.constant 0 : index
    %12 = vector.load %arg5[%c0_8, %c0_9] : memref<4x1xf32, #tpu.memory_space<vmem>>, vector<4x1xf32>
    %13 = vector.broadcast %1 : vector<1x512xf32> to vector<4x512xf32>
    %14 = vector.broadcast %12 : vector<4x1xf32> to vector<4x512xf32>
    %15 = arith.mulf %13, %14 : vector<4x512xf32>
    %c0_10 = arith.constant 0 : index
    %c0_11 = arith.constant 0 : index
    %16 = vector.load %arg6[%c0_10, %c0_11] : memref<4x1xf32, #tpu.memory_space<vmem>>, vector<4x1xf32>
    %17 = vector.broadcast %16 : vector<4x1xf32> to vector<4x512xf32>
    %18 = arith.addf %15, %17 : vector<4x512xf32>
    %cst_12 = arith.constant 0.000000e+00 : f32
    %19 = vector.broadcast %cst_12 : f32 to vector<4x512xf32>
    %20 = arith.maximumf %18, %19 : vector<4x512xf32>
    %21 = vector.extract_strided_slice %2 {offsets = [0, 0], sizes = [1, 512], strides = [1, 1]} : vector<2x512xf32> to vector<1x512xf32>
    "tpu.trace_start"() <{level = 10 : i32, message = "ad,cd->ac"}> : () -> ()
    %cst_13 = arith.constant dense<0.000000e+00> : vector<1x16xf32>
    %22 = tpu.matmul %21, %11, %cst_13 {dimension_numbers = #tpu.dot_dimension_numbers<[1], [1], [0], [0], [0, 0, 1, 0], [], []>} : vector<1x512xf32>, vector<16x512xf32>, vector<1x16xf32> -> vector<1x16xf32>
    "tpu.trace_stop"() : () -> ()
    %23 = vector.extract_strided_slice %2 {offsets = [1, 0], sizes = [1, 512], strides = [1, 1]} : vector<2x512xf32> to vector<1x512xf32>
    "tpu.trace_start"() <{level = 10 : i32, message = "ad,cd->ac"}> : () -> ()
    %cst_14 = arith.constant dense<0.000000e+00> : vector<1x4xf32>
    %24 = tpu.matmul %23, %20, %cst_14 {dimension_numbers = #tpu.dot_dimension_numbers<[1], [1], [0], [0], [0, 0, 1, 0], [], []>} : vector<1x512xf32>, vector<4x512xf32>, vector<1x4xf32> -> vector<1x4xf32>
    "tpu.trace_stop"() : () -> ()
    %c0_15 = arith.constant 0 : index
    %c0_16 = arith.constant 0 : index
    %25 = vector.load %arg7[%c0_15, %c0_16] : memref<16x20xf32, #tpu.memory_space<vmem>>, vector<16x20xf32>
    %cst_17 = arith.constant dense<0.000000e+00> : vector<1x20xf32>
    %26 = tpu.matmul %22, %25, %cst_17 {dimension_numbers = #tpu.dot_dimension_numbers<[1], [0], [0], [1], [0, 0, 1, 1], [], []>} : vector<1x16xf32>, vector<16x20xf32>, vector<1x20xf32> -> vector<1x20xf32>
    %c0_18 = arith.constant 0 : index
    %c0_19 = arith.constant 0 : index
    %27 = vector.load %arg8[%c0_18, %c0_19] : memref<4x20xf32, #tpu.memory_space<vmem>>, vector<4x20xf32>
    %cst_20 = arith.constant dense<0.000000e+00> : vector<1x20xf32>
    %28 = tpu.matmul %24, %27, %cst_20 {dimension_numbers = #tpu.dot_dimension_numbers<[1], [0], [0], [1], [0, 0, 1, 1], [], []>} : vector<1x4xf32>, vector<4x20xf32>, vector<1x20xf32> -> vector<1x20xf32>
    %29 = arith.addf %26, %28 : vector<1x20xf32>
    %c0_21 = arith.constant 0 : index
    %c0_22 = arith.constant 0 : index
    %30 = vector.load %arg9[%c0_21, %c0_22] : memref<1x20xf32, #tpu.memory_space<vmem>>, vector<1x20xf32>
    %31 = arith.addf %29, %30 : vector<1x20xf32>
    %32 = vector.extract_strided_slice %31 {offsets = [0, 0], sizes = [1, 8], strides = [1, 1]} : vector<1x20xf32> to vector<1x8xf32>
    %cst_23 = arith.constant dense<0xFF800000> : vector<1xf32>
    %33 = vector.multi_reduction <maximumf>, %32, %cst_23 [1] : vector<1x8xf32> to vector<1xf32>
    %34 = vector.shape_cast %33 : vector<1xf32> to vector<1x1xf32>
    %35 = vector.broadcast %34 : vector<1x1xf32> to vector<1x8xf32>
    %36 = arith.subf %32, %35 : vector<1x8xf32>
    %37 = math.exp %36 : vector<1x8xf32>
    %cst_24 = arith.constant dense<0.000000e+00> : vector<1xf32>
    %38 = vector.multi_reduction <add>, %37, %cst_24 [1] : vector<1x8xf32> to vector<1xf32>
    %39 = vector.shape_cast %38 : vector<1xf32> to vector<1x1xf32>
    %40 = tpu.reciprocal %39 : vector<1x1xf32> -> vector<1x1xf32>
    %41 = vector.broadcast %40 : vector<1x1xf32> to vector<1x8xf32>
    %42 = arith.mulf %37, %41 : vector<1x8xf32>
    %43 = vector.extract_strided_slice %31 {offsets = [0, 8], sizes = [1, 12], strides = [1, 1]} : vector<1x20xf32> to vector<1x12xf32>
    %cst_25 = arith.constant dense<0xFF800000> : vector<1xf32>
    %44 = vector.multi_reduction <maximumf>, %43, %cst_25 [1] : vector<1x12xf32> to vector<1xf32>
    %45 = vector.shape_cast %44 : vector<1xf32> to vector<1x1xf32>
    %46 = vector.broadcast %45 : vector<1x1xf32> to vector<1x12xf32>
    %47 = arith.subf %43, %46 : vector<1x12xf32>
    %48 = math.exp %47 : vector<1x12xf32>
    %cst_26 = arith.constant dense<0.000000e+00> : vector<1xf32>
    %49 = vector.multi_reduction <add>, %48, %cst_26 [1] : vector<1x12xf32> to vector<1xf32>
    %50 = vector.shape_cast %49 : vector<1xf32> to vector<1x1xf32>
    %51 = tpu.reciprocal %50 : vector<1x1xf32> -> vector<1x1xf32>
    %52 = vector.broadcast %51 : vector<1x1xf32> to vector<1x12xf32>
    %53 = arith.mulf %48, %52 : vector<1x12xf32>
    %cst_27 = arith.constant 0.000000e+00 : f32
    %54 = vector.broadcast %cst_27 : f32 to vector<1x1x128xf32>
    %c0_28 = arith.constant 0 : index
    %c0_29 = arith.constant 0 : index
    %c0_30 = arith.constant 0 : index
    %55 = vector.load %arg10[%c0_28, %c0_29, %c0_30] : memref<1x1x128xf32, #tpu.memory_space<vmem>>, vector<1x1x128xf32>
    tpu.vector_store %arg10[%c0_28, %c0_29, %c0_30], %54 {strides = array<i32>} : memref<1x1x128xf32, #tpu.memory_space<vmem>>, vector<1x1x128xf32>,
    %c0_31 = arith.constant 0 : index
    %c0_32 = arith.constant 0 : index
    %c0_33 = arith.constant 0 : index
    %56 = vector.load %arg10[%c0_31, %c0_32, %c0_33] : memref<1x1x128xf32, #tpu.memory_space<vmem>>, vector<1x1x8xf32>
    %57 = vector.shape_cast %56 : vector<1x1x8xf32> to vector<1x8xf32>
    %58 = vector.shape_cast %42 : vector<1x8xf32> to vector<1x1x8xf32>
    tpu.vector_store %arg10[%c0_31, %c0_32, %c0_33], %58 {strides = array<i32>} : memref<1x1x128xf32, #tpu.memory_space<vmem>>, vector<1x1x8xf32>,
    %c0_34 = arith.constant 0 : index
    %c0_35 = arith.constant 0 : index
    %c8 = arith.constant 8 : index
    %59 = vector.load %arg10[%c0_34, %c0_35, %c8] : memref<1x1x128xf32, #tpu.memory_space<vmem>>, vector<1x1x12xf32>
    %60 = vector.shape_cast %59 : vector<1x1x12xf32> to vector<1x12xf32>
    %61 = vector.shape_cast %53 : vector<1x12xf32> to vector<1x1x12xf32>
    tpu.vector_store %arg10[%c0_34, %c0_35, %c8], %61 {strides = array<i32>} : memref<1x1x128xf32, #tpu.memory_space<vmem>>, vector<1x1x12xf32>,
    %c0_36 = arith.constant 0 : index
    %c0_37 = arith.constant 0 : index
    %c20 = arith.constant 20 : index
    %62 = vector.load %arg10[%c0_36, %c0_37, %c20] : memref<1x1x128xf32, #tpu.memory_space<vmem>>, vector<1x1x16xf32>
    %63 = vector.shape_cast %62 : vector<1x1x16xf32> to vector<1x16xf32>
    %64 = vector.shape_cast %22 : vector<1x16xf32> to vector<1x1x16xf32>
    tpu.vector_store %arg10[%c0_36, %c0_37, %c20], %64 {strides = array<i32>} : memref<1x1x128xf32, #tpu.memory_space<vmem>>, vector<1x1x16xf32>,
    %c0_38 = arith.constant 0 : index
    %c0_39 = arith.constant 0 : index
    %c36 = arith.constant 36 : index
    %65 = vector.load %arg10[%c0_38, %c0_39, %c36] : memref<1x1x128xf32, #tpu.memory_space<vmem>>, vector<1x1x4xf32>
    %66 = vector.shape_cast %65 : vector<1x1x4xf32> to vector<1x4xf32>
    %67 = vector.shape_cast %24 : vector<1x4xf32> to vector<1x1x4xf32>
    tpu.vector_store %arg10[%c0_38, %c0_39, %c36], %67 {strides = array<i32>} : memref<1x1x128xf32, #tpu.memory_space<vmem>>, vector<1x1x4xf32>,
    return
  }
  func.func @transform_0(%arg0: i32) -> (i32, i32, i32) {
    %c0_i32 = arith.constant 0 : i32
    %c0_i32_0 = arith.constant 0 : i32
    %c0_i32_1 = arith.constant 0 : i32
    return %arg0, %c0_i32, %c0_i32_0 : i32, i32, i32
  }
  func.func @transform_1(%arg0: i32) -> (i32, i32) {
    %c0_i32 = arith.constant 0 : i32
    %c0_i32_0 = arith.constant 0 : i32
    %c0_i32_1 = arith.constant 0 : i32
    return %c0_i32, %c0_i32_0 : i32, i32
  }
  func.func @transform_2(%arg0: i32) -> (i32, i32) {
    %c0_i32 = arith.constant 0 : i32
    %c0_i32_0 = arith.constant 0 : i32
    %c0_i32_1 = arith.constant 0 : i32
    return %c0_i32, %c0_i32_0 : i32, i32
  }
  func.func @transform_3(%arg0: i32) -> (i32, i32) {
    %c0_i32 = arith.constant 0 : i32
    %c0_i32_0 = arith.constant 0 : i32
    %c0_i32_1 = arith.constant 0 : i32
    return %c0_i32, %c0_i32_0 : i32, i32
  }
  func.func @transform_4(%arg0: i32) -> (i32, i32) {
    %c0_i32 = arith.constant 0 : i32
    %c0_i32_0 = arith.constant 0 : i32
    %c0_i32_1 = arith.constant 0 : i32
    return %c0_i32, %c0_i32_0 : i32, i32
  }
  func.func @transform_5(%arg0: i32) -> (i32, i32) {
    %c0_i32 = arith.constant 0 : i32
    %c0_i32_0 = arith.constant 0 : i32
    %c0_i32_1 = arith.constant 0 : i32
    return %c0_i32, %c0_i32_0 : i32, i32
  }
  func.func @transform_6(%arg0: i32) -> (i32, i32) {
    %c0_i32 = arith.constant 0 : i32
    %c0_i32_0 = arith.constant 0 : i32
    %c0_i32_1 = arith.constant 0 : i32
    return %c0_i32, %c0_i32_0 : i32, i32
  }
  func.func @transform_7(%arg0: i32) -> (i32, i32) {
    %c0_i32 = arith.constant 0 : i32
    %c0_i32_0 = arith.constant 0 : i32
    %c0_i32_1 = arith.constant 0 : i32
    return %c0_i32, %c0_i32_0 : i32, i32
  }
  func.func @transform_8(%arg0: i32) -> (i32, i32) {
    %c0_i32 = arith.constant 0 : i32
    %c0_i32_0 = arith.constant 0 : i32
    %c0_i32_1 = arith.constant 0 : i32
    return %c0_i32, %c0_i32_0 : i32, i32
  }
  func.func @transform_9(%arg0: i32) -> (i32, i32, i32) {
    %c0_i32 = arith.constant 0 : i32
    %c0_i32_0 = arith.constant 0 : i32
    %c0_i32_1 = arith.constant 0 : i32
    return %arg0, %c0_i32, %c0_i32_0 : i32, i32, i32
  }
}

</mosaic_0001>

<bundles_post_ra>
// kernel: _forward.1
= control target key start
LH: loop header
LB: loop body
LE: loop exit
PB: predicated region body
PF: predicated region fallthrough
CT: control target
= control target key end

     0   :  { %s856_s30 = smov 0   ;;  %s918_s0 = inlined_call_operand.vmem [shape: f32[2,1,512], index: 0, kind: input, shape index: {}]   ;;  %s919_s1 = inlined_call_operand.vmem [shape: f32[2,512], index: 1, kind: input, shape index: {}]   ;;  %s920_s2 = inlined_call_operand.vmem [shape: f32[16,1], index: 2, kind: input, shape index: {}]   ;;  %s921_s3 = inlined_call_operand.vmem [shape: f32[16,1], index: 3, kind: input, shape index: {}]   ;;  %s922_s4 = inlined_call_operand.vmem [shape: f32[4,1], index: 4, kind: input, shape index: {}]   ;;  %s923_s5 = inlined_call_operand.vmem [shape: f32[4,1], index: 5, kind: input, shape index: {}]   ;;  %s924_s6 = inlined_call_operand.vmem [shape: f32[16,20], index: 6, kind: input, shape index: {}]   ;;  %s925_s7 = inlined_call_operand.vmem [shape: f32[4,20], index: 7, kind: input, shape index: {}]   ;;  %s926_s8 = inlined_call_operand.vmem [shape: f32[1,20], index: 8, kind: input, shape index: {}]   ;;  %s927_s9 = inlined_call_operand.vmem [shape: f32[2,1,128], index: 9, kind: output, shape index: {}]  }
   0x1 LB: > { %s758_s10 = sadd.s32 4294967295, %s799_s30   ;;  %p762_p0 = scmp.ge.s32.totalorder %s799_s30, 1  ;;  %s799_s30 = sphi %s856_s30, %s19_s30  }
   0x2   : > { %p286_p1 = scmp.lt.s32.totalorder %s799_s30, 3 }
   0x4   : > { %p287_p2 = pnand %p762_p0, %p286_p1 }
   0x5   : > { %p319_p3 = scmp.lt.s32.totalorder (!%p287_p2), %s758_s10, 1  ;;  %s803_s20 = smov (!%p287_p2), 20  }
   0x6   : > { %290 = sbr.rel (%p287_p2) target bundleno = 782 (0x30e), region = 56  ;;  %s804_s21 = smov (!%p287_p2), 120  }
   0x7   : > { %s805_s22 = smov (!%p287_p2), 36  }
   0xb   : > { %v329_v0 = vld [vmem:[%s920_s2 + $0x8] sm:$0xff]  ;;  %v328_v1 = vld [vmem:[%s920_s2] sm:$0xff]  ;;  %v801_v2 = vmov 0   ;;  %s929_s10 = smov (!%p319_p3, %s758_s10), 1  ;;  %v802_v7 = vmov 0.0   ;;  %vm593_vm0 = vcmask 1043456  }
   0xc   : > { %783 = vset.pattern.permute.xlu1 %v801_v2  ;;  %782 = vset.pattern.permute.xlu0 %v801_v2  ;;  %v385_v3 = vld [vmem:[%s922_s4] sm:$0xf]  ;;  %v358_v4 = vld [vmem:[%s921_s3 + $0x8] sm:$0xff]  ;;  %s885_s25 = scalar_lea.vmem %s927_s9, %s929_s10  ;;  %s763_s26 = sshll.u32 %s929_s10, 2  ;;  %vm617_vm1 = vcmask 130048   ;;  %vm589_vm2 = vcmask 31744  }
   0xd   : > { %346 = vperm.xlu0 %782, %v329_v0   ;;  %341 = vperm.xlu1 %783, %v328_v1   ;;  %v357_v5 = vld [vmem:[%s921_s3] sm:$0xff]  ;;  %698 = vst [vmem:[%s885_s25] sm:$0x1] %v802_v7  ;;  %s322_s29 = scalar_lea.vmem %s918_s0, %s763_s26  ;;  %v587_v0 = vld [vmem:[%s924_s6 + $0x8] sm:$0xff]  ;;  %vm668_vm3 = vcmask 155712   ;;  %vm643_vm4 = vcmask 57344   ;;  %vm679_vm5 = vcmask 90112  }
   0xe   : > { %784 = vset.pattern.permute.xlu2 %v801_v2  ;;  %v395_v6 = vld [vmem:[%s923_s5] sm:$0xf]  ;;  %vm704_vm14 = vcmask 286880   ;;  %vm709_vm15 = vcmask 319776  }
   0xf   : > { %388 = vperm.xlu2 %784, %v385_v3   ;;  %v326_v9 = vld [vmem:[%s322_s29] sm:$0xf] }
  0x10   : > { %v331_v12 = vperm.slane %v326_v9, 0  ;;  %v332_v13 = vperm.slane %v326_v9, 1  ;;  %v333_v14 = vperm.slane %v326_v9, 2  ;;  %v334_v15 = vperm.slane %v326_v9, 3  ;;  %v327_v47 = vld [vmem:[%s919_s1] sm:$0xff] }
  0x11   : > { %v412_v56 = vperm.slane %v327_v47, 4  ;;  %v413_v57 = vperm.slane %v327_v47, 6  ;;  %v410_v58 = vperm.slane %v327_v47, 0  ;;  %v411_v59 = vperm.slane %v327_v47, 2  ;;  %v586_v1 = vld [vmem:[%s924_s6] sm:$0xff] }
  0x12   : > { %v500_v60 = vperm.slane %v327_v47, 5  ;;  %v501_v61 = vperm.slane %v327_v47, 7  ;;  %v498_v62 = vperm.slane %v327_v47, 1  ;;  %v499_v63 = vperm.slane %v327_v47, 3  ;;  %v588_v2 = vld [vmem:[%s925_s7] sm:$0xf] }
  0x15   : > { %366 = vperm.xlu0 %782, %v358_v4   ;;  %361 = vperm.xlu1 %783, %v357_v5  }
  0x17   : > { %398 = vperm.xlu2 %784, %v395_v6  }
  0x69   : > { %v389_v8 = vpop.permute.xlu2 %388 }
  0x6a   : > { %v391_v16 = vmul.f32 %v389_v8, %v331_v12  ;;  %v392_v17 = vmul.f32 %v389_v8, %v332_v13  ;;  %v393_v19 = vmul.f32 %v389_v8, %v333_v14  ;;  %v394_v20 = vmul.f32 %v389_v8, %v334_v15 }
  0x71   : > { %v399_v18 = vpop.permute.xlu2 %398 }
  0x72   : > { %v401_v29 = vadd.f32 %v399_v18, %v391_v16  ;;  %v402_v30 = vadd.f32 %v399_v18, %v392_v17  ;;  %v403_v45 = vadd.f32 %v399_v18, %v393_v19  ;;  %v404_v46 = vadd.f32 %v399_v18, %v394_v20  ;;  %v641_v19 = vld [vmem:[%s926_s8] sm:$0x1] }
  0x74   : > { %v405_v50 = vmax.f32 %v401_v29, 0.0  ;;  %v406_v51 = vmax.f32 %v402_v30, 0.0  ;;  %v407_v54 = vmax.f32 %v403_v45, 0.0  ;;  %v408_v55 = vmax.f32 %v404_v46, 0.0 }
  0x7f   : > { %v347_v10 = vpop.permute.xlu0 %346  ;;  %v342_v11 = vpop.permute.xlu1 %341 }
  0x80   : > { %v353_v21 = vmul.f32 %v347_v10, %v331_v12  ;;  %v354_v22 = vmul.f32 %v347_v10, %v332_v13  ;;  %v355_v23 = vmul.f32 %v347_v10, %v333_v14  ;;  %v356_v24 = vmul.f32 %v347_v10, %v334_v15 }
  0x81   : > { %v349_v27 = vmul.f32 %v342_v11, %v331_v12  ;;  %v350_v28 = vmul.f32 %v342_v11, %v332_v13  ;;  %v351_v37 = vmul.f32 %v342_v11, %v333_v14  ;;  %v352_v38 = vmul.f32 %v342_v11, %v334_v15 }
  0x87   : > { %v367_v25 = vpop.permute.xlu0 %366  ;;  %v362_v26 = vpop.permute.xlu1 %361 }
  0x88   : > { %v373_v31 = vadd.f32 %v367_v25, %v353_v21  ;;  %v374_v32 = vadd.f32 %v367_v25, %v354_v22  ;;  %v375_v33 = vadd.f32 %v367_v25, %v355_v23  ;;  %v376_v34 = vadd.f32 %v367_v25, %v356_v24 }
  0x89   : > { %v369_v35 = vadd.f32 %v362_v26, %v349_v27  ;;  %v370_v36 = vadd.f32 %v362_v26, %v350_v28  ;;  %v371_v43 = vadd.f32 %v362_v26, %v351_v37  ;;  %v372_v44 = vadd.f32 %v362_v26, %v352_v38 }
  0x8a   : > { %v381_v39 = vmax.f32 %v373_v31, 0.0  ;;  %v382_v40 = vmax.f32 %v374_v32, 0.0  ;;  %v383_v41 = vmax.f32 %v375_v33, 0.0  ;;  %v384_v42 = vmax.f32 %v376_v34, 0.0 }
  0x8b   : > { %v377_v48 = vmax.f32 %v369_v35, 0.0  ;;  %v378_v49 = vmax.f32 %v370_v36, 0.0  ;;  %v379_v52 = vmax.f32 %v371_v43, 0.0  ;;  %v380_v53 = vmax.f32 %v372_v44, 0.0 }
  0x8c   : > { %432 = vmatpush.xpose.msra.mxu0 %v381_v39  ;;  %452 = vmatpush.xpose.msra.mxu1 %v382_v40 }
  0x8d   : > { %472 = vmatpush.xpose.msra.mxu2 %v383_v41  ;;  %492 = vmatpush.xpose.msra.mxu3 %v384_v42 }
  0x90   : > { %433 = vmatpush.xpose.msra.mxu0 %v377_v48  ;;  %453 = vmatpush.xpose.msra.mxu1 %v378_v49 }
  0x91   : > { %473 = vmatpush.xpose.msra.mxu2 %v379_v52  ;;  %493 = vmatpush.xpose.msra.mxu3 %v380_v53 }
  0x93   : > { %434 = vmatmul.f32.vlgmr.msra.gmra.mxu0 %v410_v58  ;;  %454 = vmatmul.f32.vlgmr.msra.gmra.mxu1 %v411_v59 }
  0x94   : > { %521 = vmatpush.xpose.msrb.mxu0 %v405_v50  ;;  %541 = vmatpush.xpose.msrb.mxu1 %v406_v51 }
  0x95   : > { %561 = vmatpush.xpose.msrb.mxu2 %v407_v54  ;;  %581 = vmatpush.xpose.msrb.mxu3 %v408_v55 }
  0x96   : > { %474 = vmatmul.f32.vlgmr.msra.gmra.mxu2 %v412_v56  ;;  %494 = vmatmul.f32.vlgmr.msra.gmra.mxu3 %v413_v57 }
  0x98   : > { %635 = vmatpush.msra.mxu1 %v587_v0  ;;  %764 = vmatpush.msk.msra.mxu0 %vm593_vm0, %v588_v2 }
  0x9a   : > { %636 = vmatpush.msra.mxu1 %v586_v1 }
  0x9b   : > { %522 = vmatmul.f32.vlgmr.msrb.gmra.mxu0 %v498_v62  ;;  %542 = vmatmul.f32.vlgmr.msrb.gmra.mxu1 %v499_v63 }
  0x9e   : > { %562 = vmatmul.f32.vlgmr.msrb.gmra.mxu2 %v500_v60  ;;  %582 = vmatmul.f32.vlgmr.msrb.gmra.mxu3 %v501_v61 }
 0x110   : > { %v435_v3 = vpop.f32.mrf.mxu0  ;;  %v455_v4 = vpop.f32.mrf.mxu1 }
 0x111   : > { %v456_v5 = vadd.f32 %v455_v4, %v435_v3 }
 0x118   : > { %v523_v10 = vpop.f32.mrf.mxu0  ;;  %v543_v11 = vpop.f32.mrf.mxu1 }
 0x119   : > { %v475_v6 = vpop.f32.mrf.mxu2  ;;  %v495_v7 = vpop.f32.mrf.mxu3  ;;  %v544_v12 = vadd.f32 %v543_v11, %v523_v10 }
 0x11a   : > { %v476_v8 = vadd.f32 %v475_v6, %v456_v5 }
 0x11c   : > { %v496_v9 = vadd.f32 %v495_v7, %v476_v8 }
 0x11e   : > { %766 = vmatmul.msk.f32.vlgmr.msra.gmra.mxu1 %vm617_vm1, %v496_v9 }
 0x121   : > { %v563_v13 = vpop.f32.mrf.mxu2  ;;  %v583_v14 = vpop.f32.mrf.mxu3 }
 0x122   : > { %v564_v15 = vadd.f32 %v563_v13, %v544_v12 }
 0x124   : > { %v584_v16 = vadd.f32 %v583_v14, %v564_v15 }
 0x126   : > { %765 = vmatmul.msk.f32.vlgmr.msra.gmra.mxu0 %vm589_vm2, %v584_v16 }
 0x19b   : > { %v638_v17 = vpop.f32.mrf.mxu1 }
 0x1a3   : > { %v614_v18 = vpop.f32.mrf.mxu0 }
 0x1a4   : > { %v639_v20 = vadd.f32 %v638_v17, %v614_v18 }
 0x1a6   : > { %v642_v21 = vadd.f32 %v641_v19, %v639_v20 }
 0x1a8   : > { %v669_v22 = vsel %vm668_vm3, %v642_v21, -inf  ;;  %v644_v23 = vsel %vm643_vm4, %v642_v21, -inf }
 0x1a9   : > { %670 = vmax.xlane.f32.xlu0 %v669_v22  ;;  %645 = vmax.xlane.f32.xlu1 %v644_v23 }
 0x1c2   : > { %701 = vrot.lane.b32.xlu1 %v496_v9, %s803_s20 }
 0x21c   : > { %v671_v24 = vpop.xlane.xlu0 %670  ;;  %v646_v28 = vpop.xlane.xlu1 %645 }
 0x21d   : > { %v672_v25 = vsub.f32 %v642_v21, %v671_v24  ;;  %v647_v29 = vsub.f32 %v642_v21, %v646_v28 }
 0x21f   : > { %v673_v26 = vmul.f32 1.442695, %v672_v25  ;;  %v648_v30 = vmul.f32 1.442695, %v647_v29 }
 0x221   : > { %785 = vpow2.f32 %v673_v26 }
 0x222   : > { %787 = vpow2.f32 %v648_v30 }
 0x227   : > { %v786_v27 = vpop.eup %785 }
 0x228   : > { %676 = vrot.lane.b32.xlu2 %v786_v27, %s804_s21  ;;  %v788_v31 = vpop.eup %787 }
 0x229   : > { %v650_v32 = vsel %vm643_vm4, %v788_v31, 0.0 }
 0x234   : > { %v702_v59 = vpop.permute.xlu1 %701 }
 0x251   : > { %651 = vadd.xlane.f32.xlu2 %v650_v32 }
 0x269   : > { %706 = vrot.lane.b32.xlu2 %v584_v16, %s805_s22 }
 0x282   : > { %v677_v33 = vpop.permute.xlu2 %676 }
 0x283   : > { %v680_v34 = vsel %vm679_vm5, %v677_v33, 0.0 }
 0x284   : > { %681 = vadd.xlane.f32.xlu0 %v680_v34 }
 0x2c4   : > { %v652_v35 = vpop.xlane.xlu2 %651 }
 0x2c5   : > { %789 = vrcp.f32 %v652_v35  ;;  %v664_v39 = vand.u32 2147483648, %v652_v35  ;;  %v662_v41 = vand.u32 2147483647, %v652_v35  ;;  %vm658_vm7 = vweird.f32 %v652_v35 }
 0x2c7   : > { %v665_v43 = vor.u32 1.1754944e-38, %v664_v39  ;;  %vm663_vm9 = vcmp.eq.f32.partialorder %v662_v41, 8.507059e+37 }
 0x2cb   : > { %v790_v36 = vpop.eup %789 }
 0x2cc   : > { %v654_v37 = vmul.f32 %v790_v36, %v652_v35  ;;  %vm659_vm6 = vweird.f32 %v790_v36  ;;  %v707_v60 = vpop.permute.xlu2 %706 }
 0x2cd   : > { %vm660_vm8 = vmor %vm658_vm7, %vm659_vm6 }
 0x2ce   : > { %v655_v38 = vsub.f32 1.0, %v654_v37 }
 0x2d0   : > { %v656_v40 = vmul.f32 %v790_v36, %v655_v38 }
 0x2d2   : > { %v657_v42 = vadd.f32 %v790_v36, %v656_v40 }
 0x2d4   : > { %v661_v44 = vsel %vm660_vm8, %v790_v36, %v657_v42 }
 0x2d5   : > { %v666_v45 = vsel %vm663_vm9, %v665_v43, %v661_v44 }
 0x2d6   : > { %v667_v46 = vmul.f32 %v788_v31, %v666_v45 }
 0x2d8   : > { %699 = vst.msk [vmem:[%s885_s25] sm:$0x1] %vm643_vm4, %v667_v46 }
 0x2f7   : > { %v682_v47 = vpop.xlane.xlu0 %681 }
 0x2f8   : > { %791 = vrcp.f32 %v682_v47  ;;  %v694_v51 = vand.u32 2147483648, %v682_v47  ;;  %v692_v53 = vand.u32 2147483647, %v682_v47  ;;  %vm688_vm11 = vweird.f32 %v682_v47 }
 0x2fa   : > { %v695_v55 = vor.u32 1.1754944e-38, %v694_v51  ;;  %vm693_vm13 = vcmp.eq.f32.partialorder %v692_v53, 8.507059e+37 }
 0x2fe   : > { %v792_v48 = vpop.eup %791 }
 0x2ff   : > { %v684_v49 = vmul.f32 %v792_v48, %v682_v47  ;;  %vm689_vm10 = vweird.f32 %v792_v48 }
 0x300   : > { %vm690_vm12 = vmor %vm688_vm11, %vm689_vm10 }
 0x301   : > { %v685_v50 = vsub.f32 1.0, %v684_v49 }
 0x303   : > { %v686_v52 = vmul.f32 %v792_v48, %v685_v50 }
 0x305   : > { %v687_v54 = vadd.f32 %v792_v48, %v686_v52 }
 0x307   : > { %v691_v56 = vsel %vm690_vm12, %v792_v48, %v687_v54 }
 0x308   : > { %v696_v57 = vsel %vm693_vm13, %v695_v55, %v691_v56 }
 0x309   : > { %v697_v58 = vmul.f32 %v786_v27, %v696_v57 }
 0x30b   : > { %700 = vst.msk [vmem:[%s885_s25] sm:$0x1] %vm668_vm3, %v697_v58 }
 0x30c   : > { %705 = vst.msk [vmem:[%s885_s25] sm:$0x1] %vm704_vm14, %v702_v59 }
 0x30d   : > { %710 = vst.msk [vmem:[%s885_s25] sm:$0x1] %vm709_vm15, %v707_v60 }
 0x30e PF: > { %s19_s30 = sadd.s32 1, %s799_s30  }
 0x30f   : > { %p16_p4 = scmp.ge.s32.totalorder %s19_s30, 4  }
 0x311   :  { %18 = sbr.rel (!%p16_p4) target bundleno = 1 (0x1), region = 86 }

</bundles_post_ra>
